<compile_context>
chip_gen: v7x
topology: tpu7x:2x2x1
jax: 0.10.0
libtpu: 0.0.40
codegen_flags: <defaults>
</compile_context>

<pallas_src>
import jax
import jax.numpy as jnp
from jax.experimental import pallas as pl
from jax.experimental.pallas import tpu as pltpu


def _context_mask_kernel(scale_ref, index_ref, bias_ref, o_ref):
    scale = scale_ref[0, 0]                                   # SMEM scalar
    # sigmoid(-s*(idx - c + w/2)) == sigmoid(bias - s*idx),  bias = s*(c - w/2)
    x = bias_ref[...] - scale * index_ref[...].astype(jnp.float32)  # (Bt,1) bcast over L
    # single-transcendental sigmoid: sigmoid(x) = 0.5*tanh(0.5*x) + 0.5
    o_ref[...] = (0.5 * jnp.tanh(0.5 * x) + 0.5).astype(o_ref.dtype)


def _round_up(x, m):
    return ((x + m - 1) // m) * m


def _sublane_multiple(dtype):
    # f32 -> 8, bf16/f16 -> 16, int8/fp8 -> 32 (sub-32-bit dtypes pack sublanes)
    return 8 * max(1, 4 // jnp.dtype(dtype).itemsize)


_TARGET_TILE_BYTES = 2 * 1024 * 1024   # per-buffer cap; safe for v5e default scoped VMEM
_TINY_FALLBACK_ELEMS = 4096            # below this, XLA fusion beats kernel launch cost


def context_mask_l(index, c, w, scale, out_dtype=jnp.float32, force_pallas=False):
    """index: (B, L, 1), c: (B, 1, 1), w: (B, 1, 1) -> (B, L, 1)."""
    B, L, _ = index.shape
    scale_f = jnp.asarray(scale, jnp.float32)

    if (B * L <= _TINY_FALLBACK_ELEMS) and not force_pallas:
        # Tiny-shape fallback: no bandwidth to hide, launch overhead dominates.
        return jax.nn.sigmoid(
            -scale_f * (index.astype(jnp.float32)
                        - c.astype(jnp.float32)
                        + 0.5 * w.astype(jnp.float32))
        ).astype(out_dtype)

    index2 = index.reshape(B, L)                               # keep caller dtype
    bias2 = scale_f * (c.reshape(B, 1).astype(jnp.float32)
                       - 0.5 * w.reshape(B, 1).astype(jnp.float32))   # (B, 1) f32
    scale2 = scale_f.reshape(1, 1)

    # Lane-dense tiling: L on lanes (multiple of 128), B on sublanes.
    sub = max(_sublane_multiple(index.dtype), _sublane_multiple(out_dtype))
    Bt = min(256, _round_up(B, sub))
    lane_cap = max(128, (_TARGET_TILE_BYTES // (Bt * 4)) // 128 * 128)
    Lt = min(_round_up(L, 128), lane_cap)

    # v7x: guarantee >= 2 grid blocks along a 'parallel' axis when the slab is
    # big enough to matter, so both TensorCores contribute HBM bandwidth.
    while (pl.cdiv(B, Bt) * pl.cdiv(L, Lt) < 2) and (B * L * 4 > (1 << 20)):
        if Lt > 128:
            Lt = _round_up(Lt // 2, 128)
        elif Bt > sub:
            Bt = _round_up(Bt // 2, sub)
        else:
            break

    grid = (pl.cdiv(B, Bt), pl.cdiv(L, Lt))

    out2 = pl.pallas_call(
        _context_mask_kernel,
        out_shape=jax.ShapeDtypeStruct((B, L), out_dtype),
        grid=grid,
        in_specs=[
            pl.BlockSpec((1, 1), lambda i, j: (0, 0),
                         memory_space=pltpu.MemorySpace.SMEM),     # scale
            pl.BlockSpec((Bt, Lt), lambda i, j: (i, j)),           # index tile
            pl.BlockSpec((Bt, 1), lambda i, j: (i, 0)),            # bias (resident across L)
        ],
        out_specs=pl.BlockSpec((Bt, Lt), lambda i, j: (i, j)),
        compiler_params=pltpu.CompilerParams(
            dimension_semantics=("parallel", "parallel")),
    )(scale2, index2, bias2)

    return out2.reshape(B, L, 1)


if __name__ == "__main__":
    scale = 10.0
    key = jax.random.PRNGKey(0)

    def run_and_check(B, L, force_pallas):
        k1, k2, k3 = jax.random.split(jax.random.fold_in(key, B * 10007 + L), 3)
        index = jax.random.uniform(k1, (B, L, 1), dtype=jnp.float32)     # positions
        c = jax.random.uniform(k2, (B, 1, 1), dtype=jnp.float32)         # context center
        w = jax.random.uniform(k3, (B, 1, 1), dtype=jnp.float32) * 0.5   # context width
        masks = jax.block_until_ready(
            context_mask_l(index, c, w, scale, force_pallas=force_pallas))
        ref = jax.nn.sigmoid(-scale * (index - c + w / 2.0))
        assert masks.shape == (B, L, 1)
        assert jnp.allclose(masks, ref, atol=1e-5, rtol=1e-5), (
            f"mismatch vs reference for B={B}, L={L}, force_pallas={force_pallas}")

    run_and_check(2, 8, force_pallas=False)    # tiny shape -> jnp fallback path
    run_and_check(2, 8, force_pallas=True)     # same shape through the Pallas path
    run_and_check(3, 260, force_pallas=True)   # ragged tile edges on both grid axes
    run_and_check(8, 1024, force_pallas=True)  # lane-dense multi-tile extent

    print("KERNEL_OK")
</pallas_src>

<mosaic_0001>
module attributes {stable_mosaic.version = 11 : i64} {
  func.func @_context_mask_kernel(%arg0: i32, %arg1: i32, %arg2: memref<1x1xf32, #tpu.memory_space<smem>>, %arg3: memref<8x128xf32, #tpu.memory_space<vmem>>, %arg4: memref<8x1xf32, #tpu.memory_space<vmem>>, %arg5: memref<8x128xf32, #tpu.memory_space<vmem>>) attributes {dimension_semantics = [#tpu.dimension_semantics<parallel>, #tpu.dimension_semantics<parallel>], iteration_bounds = array<i64: 1, 1>, scalar_prefetch = 0 : i64, scratch_operands = 0 : i64, tpu.core_type = #tpu.core_type<tc>, window_params = [{transform_indices = @transform_0, window_bounds = array<i64: 1, 1>}, {transform_indices = @transform_1, window_bounds = array<i64: 8, 128>}, {transform_indices = @transform_2, window_bounds = array<i64: 8, 1>}, {transform_indices = @transform_3, window_bounds = array<i64: 8, 128>}]} {
    %c0 = arith.constant 0 : index
    %c0_0 = arith.constant 0 : index
    %0 = memref.load %arg2[%c0, %c0_0] : memref<1x1xf32, #tpu.memory_space<smem>>
    %c0_1 = arith.constant 0 : index
    %c0_2 = arith.constant 0 : index
    %1 = vector.load %arg4[%c0_1, %c0_2] : memref<8x1xf32, #tpu.memory_space<vmem>>, vector<8x1xf32>
    %c0_3 = arith.constant 0 : index
    %c0_4 = arith.constant 0 : index
    %2 = vector.load %arg3[%c0_3, %c0_4] : memref<8x128xf32, #tpu.memory_space<vmem>>, vector<8x128xf32>
    %3 = vector.broadcast %0 : f32 to vector<8x128xf32>
    %4 = arith.mulf %3, %2 : vector<8x128xf32>
    %5 = vector.broadcast %1 : vector<8x1xf32> to vector<8x128xf32>
    %6 = arith.subf %5, %4 : vector<8x128xf32>
    %cst = arith.constant 5.000000e-01 : f32
    %7 = vector.broadcast %cst : f32 to vector<8x128xf32>
    %8 = arith.mulf %7, %6 : vector<8x128xf32>
    %9 = math.tanh %8 : vector<8x128xf32>
    %cst_5 = arith.constant 5.000000e-01 : f32
    %10 = vector.broadcast %cst_5 : f32 to vector<8x128xf32>
    %11 = arith.mulf %10, %9 : vector<8x128xf32>
    %cst_6 = arith.constant 5.000000e-01 : f32
    %12 = vector.broadcast %cst_6 : f32 to vector<8x128xf32>
    %13 = arith.addf %11, %12 : vector<8x128xf32>
    %c0_7 = arith.constant 0 : index
    %c0_8 = arith.constant 0 : index
    %14 = vector.load %arg5[%c0_7, %c0_8] : memref<8x128xf32, #tpu.memory_space<vmem>>, vector<8x128xf32>
    tpu.vector_store %arg5[%c0_7, %c0_8], %13 {strides = array<i32>} : memref<8x128xf32, #tpu.memory_space<vmem>>, vector<8x128xf32>,
    return
  }
  func.func @transform_0(%arg0: i32, %arg1: i32) -> (i32, i32) {
    %c0_i32 = arith.constant 0 : i32
    %c0_i32_0 = arith.constant 0 : i32
    %c0_i32_1 = arith.constant 0 : i32
    return %c0_i32, %c0_i32_0 : i32, i32
  }
  func.func @transform_1(%arg0: i32, %arg1: i32) -> (i32, i32) {
    %c0_i32 = arith.constant 0 : i32
    return %arg0, %arg1 : i32, i32
  }
  func.func @transform_2(%arg0: i32, %arg1: i32) -> (i32, i32) {
    %c0_i32 = arith.constant 0 : i32
    %c0_i32_0 = arith.constant 0 : i32
    return %arg0, %c0_i32 : i32, i32
  }
  func.func @transform_3(%arg0: i32, %arg1: i32) -> (i32, i32) {
    %c0_i32 = arith.constant 0 : i32
    return %arg0, %arg1 : i32, i32
  }
}

</mosaic_0001>

<bundles_post_ra>
// kernel: tpu_custom_call.1
= control target key start
LH: loop header
LB: loop body
LE: loop exit
PB: predicated region body
PF: predicated region fallthrough
CT: control target
= control target key end

     0   :  { %s124_s0 = inlined_call_operand.<no memory space> [shape: f32[1,1], index: 0, kind: input, shape index: {}]   ;;  %s125_s1 = inlined_call_operand.vmem [shape: f32[2,8], index: 1, kind: input, shape index: {}]   ;;  %s126_s2 = inlined_call_operand.vmem [shape: f32[2,1], index: 2, kind: input, shape index: {}]   ;;  %s127_s3 = inlined_call_operand.hbm [shape: f32[2,8], index: 3, kind: output, shape index: {}]  }
   0x1   :  { %v17_v0 = vld [vmem:[%s126_s2] sm:$0xff] }
   0x2   :  { %9 = vsyncpa [#allocation4], 0  ;;  %v79_v1 = vmov 0   ;;  %v18_v2 = vld [vmem:[%s125_s1] sm:$0xff]  ;;  %v19_v3 = vstv %s124_s0 }
   0x3   :  { %52 = vset.pattern.permute.xlu0 %v79_v1  ;;  %v20_v4 = vmul.f32 %v19_v3, %v18_v2 }
   0x4   :  { %23 = vperm.xlu0 %52, %v17_v0  }
  0x83   :  { %v24_v5 = vpop.permute.xlu0 %23 }
  0x84   :  { %v26_v6 = vsub.f32 %v24_v5, %v20_v4 }
  0x86   :  { %v27_v7 = vmul.f32 0.5, %v26_v6 }
  0x88   :  { %53 = vtanh.f32 %v27_v7 }
  0x92   :  { %v54_v8 = vpop.eup %53 }
  0x93   :  { %v29_v9 = vmul.f32 0.5, %v54_v8 }
  0x95   :  { %v30_v10 = vadd.f32 0.5, %v29_v9 }
  0x97   :  { %31 = vst [vmem:[#allocation3] sm:$0xff] %v30_v10 }
  0x98   :  { %36 = vsyncadd [#allocation4], 96  ;;  %s80_s2 = smov [#allocation3]  }
  0x99   :  { %s37_s18 = sshll.u32 %s80_s2, 4  ;;  %s38_s18 = int_to_ptr.vmem [resolvable:$true] %s37_s18 }
  0x9a   :  { %s55_s19 = scalar_lea.vmem %s38_s18, 32  ;;  %s59_s1 = scalar_lea.vmem %s38_s18, 128 }
  0x9b   :  { %p56_p0 = scmp.ne.s32.totalorder %s38_s18, %s55_s19  ;;  %p60_p1 = scmp.lt.s32.totalorder %s38_s18, %s38_s18 }
  0x9c   :  { %p61_p2 = scmp.lt.s32.totalorder %s59_s1, %s55_s19 }
  0x9e   :  { %p62_p3 = por %p61_p2, %p60_p1 }
  0xa0   :  { %p63_p4 = pnand %p62_p3, %p56_p0 }
  0xa2   :  { %66 = shalt.err (!%p63_p4)
}
  0xa3   :  { %s67_s21 = scalar_lea.hbm %s127_s3, 32 }
  0xa4   :  { %p68_p5 = scmp.ne.s32.totalorder %s127_s3, %s67_s21  ;;  %p71_p6 = scmp.lt.u32.totalorder %s67_s21, %s127_s3 }
  0xa6   :  { %p73_p7 = pnand %p71_p6, %p68_p5 }
  0xa8   :  { %76 = shalt.err (!%p73_p7)
}
  0xa9   :  { %s81_s26 = smov 32   ;;  %s82_s27 = smov 2  }
  0xaa   :  { %43 = dma.vmem_to_hbm [thread:$0]  %s38_s18, 32, %s127_s3, [#allocation4], %s81_s26, %s81_s26, %s82_s27  }
  0xab   :  { %77 = dma.done.wait [#allocation4], 128  }
  0xac   :  { %78 = vsyncadd [#allocation4], 4294967168 }
  0xad   :  { %47 = vsyncpa [#allocation4], 1 }

</bundles_post_ra>
